<compile_context>
chip_gen: v7x
topology: tpu7x:2x2x1
jax: 0.10.0
libtpu: 0.0.40
codegen_flags: <defaults>
</compile_context>

<pallas_src>
import numpy as np
import jax
import jax.numpy as jnp
from jax.experimental import pallas as pl
from jax.experimental.pallas import tpu as pltpu


def _round_up(x, m):
    return ((x + m - 1) // m) * m


def _physical_vmem_bytes():
    """Best-effort physical VMEM size; conservative fallback (v7x per-core)."""
    try:
        return int(pltpu.get_tpu_info().vmem_capacity_bytes)
    except Exception:
        return 64 * 1024 * 1024


def _device_kind():
    try:
        return jax.devices()[0].device_kind.lower()
    except Exception:
        return ""


def _linear_kernel(x_ref, w_ref, b_ref, o_ref):
    """One (tm, tn) output tile: full-K matmul (bf16 MXU, f32 acc) + bias."""
    x = x_ref[...]
    if x.dtype != jnp.bfloat16:
        x = x.astype(jnp.bfloat16)
    acc = jnp.dot(x, w_ref[...], preferred_element_type=jnp.float32)
    o_ref[...] = (acc + b_ref[...]).astype(o_ref.dtype)


def prepare_fusion_linear2_params(weight, bias):
    """One-time parameter prep (do this at init, NOT per forward call).

    weight: (num_class, in_features) float32  -- PyTorch nn.Linear layout
    bias:   (num_class,)             float32
    returns (weight_t_bf16 (K, N_pad), bias_2d (1, N_pad), num_class)
    """
    N, K = weight.shape
    N_pad = _round_up(N, 128)
    w_t = weight.T.astype(jnp.bfloat16)               # (K, N) bf16 for the MXU
    b2 = bias.reshape(1, N).astype(jnp.float32)
    if N_pad != N:
        # Zero-padded weight columns produce zero logits; sliced off below.
        w_t = jnp.pad(w_t, ((0, 0), (0, N_pad - N)))
        b2 = jnp.pad(b2, ((0, 0), (0, N_pad - N)))
    return w_t, b2, N


def fusion_linear2_forward(feats, weight_t_bf16, bias_2d, num_class=None,
                           out_dtype=jnp.float32):
    """action = feats @ weight_t + bias   (Dropout == identity at inference).

    feats:         (M, K)     float32 or bfloat16
    weight_t_bf16: (K, N_pad) bfloat16   (from prepare_fusion_linear2_params)
    bias_2d:       (1, N_pad) float32
    returns:       (M, num_class) out_dtype
    """
    M, K = feats.shape
    K2, N_pad = weight_t_bf16.shape
    assert K == K2 and bias_2d.shape == (1, N_pad)
    N = N_pad if num_class is None else num_class

    x_bytes = np.dtype(feats.dtype).itemsize
    o_bytes = np.dtype(out_dtype).itemsize
    phys_vmem = _physical_vmem_bytes()
    budget = int(phys_vmem * 0.6)        # headroom for compiler scratch/sems
    kind = _device_kind()
    is_v5e = ("v5e" in kind) or ("v5 lite" in kind) or ("v5litepod" in kind)

    # ---- Tile selection ----------------------------------------------------
    # Weight residency: keep the whole (K, N_pad) bf16 weight in VMEM when the
    # (conservatively double-buffered) tile fits half the budget.  Its block
    # index is then constant across row tiles -> fetched exactly once.
    weight_bytes_2buf = 2 * K * N_pad * 2
    if weight_bytes_2buf <= budget // 2:
        tn = N_pad
    else:
        # Streaming fallback: 128-wide on v5e (4x128 MXU), else 256-wide.
        tn = 256 if (not is_v5e and N_pad % 256 == 0) else 128

    # Largest row tile that fits the VMEM budget (double-buffered x/w/out/bias).
    M_pad = _round_up(M, 8)
    tm = None
    for cand in (1024, 512, 256, 128, 64, 32, 16):
        t = min(M_pad, cand)
        need = (2 * (t * K * x_bytes) + 2 * (K * tn * 2)
                + 2 * (t * tn * o_bytes) + 2 * (tn * 4))
        if need <= budget:
            tm = t
            break
    if tm is None:
        tm = min(M_pad, 16) if M_pad >= 16 else M_pad

    M_final = _round_up(M, tm)
    m_steps = M_final // tm

    # v7x has 2 TensorCores: if the grid would collapse to one step, split N in
    # two so both cores get a "parallel" step.  Harmless elsewhere.
    if m_steps == 1 and tn == N_pad and N_pad >= 256 and (N_pad // 2) % 128 == 0:
        tn = N_pad // 2
    n_steps = N_pad // tn

    # Pad feats only when the row tile does not divide M (no-op at demo shape).
    # TODO(synk): for large unaligned M, a masked tail tile would avoid this
    #             extra HBM pass entirely.
    if M_final != M:
        feats = jnp.pad(feats, ((0, M_final - M), (0, 0)))

    vmem_need = (2 * (tm * K * x_bytes) + 2 * (K * tn * 2)
                 + 2 * (tm * tn * o_bytes) + 2 * (tn * 4))
    vmem_limit = min(int(phys_vmem * 0.9),
                     max(vmem_need + (2 << 20), 32 << 20))

    cost = pl.CostEstimate(
        flops=2 * M_final * K * N_pad,
        transcendentals=0,
        bytes_accessed=(M_final * K * x_bytes + K * N_pad * 2
                        + N_pad * 4 + M_final * N_pad * o_bytes),
    )

    out = pl.pallas_call(
        _linear_kernel,
        out_shape=jax.ShapeDtypeStruct((M_final, N_pad), out_dtype),
        grid_spec=pltpu.PrefetchScalarGridSpec(
            num_scalar_prefetch=0,
            grid=(m_steps, n_steps),
            in_specs=[
                pl.BlockSpec((tm, K), lambda i, j: (i, 0)),   # feats, full K
                pl.BlockSpec((K, tn), lambda i, j: (0, j)),   # weight^T (bf16)
                pl.BlockSpec((1, tn), lambda i, j: (0, j)),   # bias
            ],
            out_specs=pl.BlockSpec((tm, tn), lambda i, j: (i, j)),
        ),
        compiler_params=pltpu.CompilerParams(
            dimension_semantics=("parallel", "parallel"),
            vmem_limit_bytes=vmem_limit,
        ),
        cost_estimate=cost,
    )(feats, weight_t_bf16, bias_2d)

    if (M_final, N_pad) != (M, N):
        out = out[:M, :N]
    return out


if __name__ == "__main__":
    # Small shapes consistent with the module: hidden=32 -> in_features=128,
    # num_class=256, batch=8.
    hidden = 32
    in_features = hidden * 4      # hidden * 4 = 128
    num_class = 256
    batch = 8

    key = jax.random.PRNGKey(0)
    k_x, k_w, k_b = jax.random.split(key, 3)

    feats = jax.random.normal(k_x, (batch, in_features), dtype=jnp.float32)
    # Deterministic synthetic parameters (PyTorch layout: (num_class, in_features)).
    weight = jax.random.normal(k_w, (num_class, in_features), dtype=jnp.float32) * 0.02
    bias = jax.random.normal(k_b, (num_class,), dtype=jnp.float32) * 0.02

    # Init-time glue: transpose + bf16-cast + N-pad the weight once.
    weight_t_bf16, bias_2d, n_out = prepare_fusion_linear2_params(weight, bias)

    action = fusion_linear2_forward(feats, weight_t_bf16, bias_2d, num_class=n_out)
    action = jax.block_until_ready(action)

    # Correctness: exact-ish vs a JAX reference with matching bf16 MXU operands,
    # looser vs the pure-f32 reference.
    ref_bf16 = (jnp.dot(feats.astype(jnp.bfloat16), weight.T.astype(jnp.bfloat16),
                        preferred_element_type=jnp.float32)
                + bias.reshape(1, -1))
    ref_f32 = feats @ weight.T + bias.reshape(1, -1)

    assert action.shape == (batch, num_class)
    assert jnp.allclose(action, ref_bf16, atol=1e-4, rtol=1e-4), "mismatch vs bf16 reference"
    assert jnp.allclose(action, ref_f32, atol=5e-2, rtol=5e-2), "mismatch vs f32 reference"

    print("KERNEL_OK")
</pallas_src>

<mosaic_0001>
module attributes {stable_mosaic.version = 11 : i64} {
  func.func @_linear_kernel(%arg0: i32, %arg1: i32, %arg2: memref<8x128xf32, #tpu.memory_space<vmem>>, %arg3: memref<128x128xbf16, #tpu.memory_space<vmem>>, %arg4: memref<1x128xf32, #tpu.memory_space<vmem>>, %arg5: memref<8x128xf32, #tpu.memory_space<vmem>>) attributes {dimension_semantics = [#tpu.dimension_semantics<parallel>, #tpu.dimension_semantics<parallel>], iteration_bounds = array<i64: 1, 2>, scalar_prefetch = 0 : i64, scratch_operands = 0 : i64, tpu.core_type = #tpu.core_type<tc>, window_params = [{transform_indices = @transform_0, window_bounds = array<i64: 8, 128>}, {transform_indices = @transform_1, window_bounds = array<i64: 128, 128>}, {transform_indices = @transform_2, window_bounds = array<i64: 1, 128>}, {transform_indices = @transform_3, window_bounds = array<i64: 8, 128>}]} {
    %c0 = arith.constant 0 : index
    %c0_0 = arith.constant 0 : index
    %0 = vector.load %arg2[%c0, %c0_0] : memref<8x128xf32, #tpu.memory_space<vmem>>, vector<8x128xf32>
    %1 = arith.truncf %0 : vector<8x128xf32> to vector<8x128xbf16>
    %c0_1 = arith.constant 0 : index
    %c0_2 = arith.constant 0 : index
    %2 = vector.load %arg3[%c0_1, %c0_2] : memref<128x128xbf16, #tpu.memory_space<vmem>>, vector<128x128xbf16>
    %cst = arith.constant dense<0.000000e+00> : vector<8x128xf32>
    %3 = tpu.matmul %1, %2, %cst {dimension_numbers = #tpu.dot_dimension_numbers<[1], [0], [0], [1], [0, 0, 1, 1], [], []>} : vector<8x128xbf16>, vector<128x128xbf16>, vector<8x128xf32> -> vector<8x128xf32>
    %c0_3 = arith.constant 0 : index
    %c0_4 = arith.constant 0 : index
    %4 = vector.load %arg4[%c0_3, %c0_4] : memref<1x128xf32, #tpu.memory_space<vmem>>, vector<1x128xf32>
    %5 = vector.broadcast %4 : vector<1x128xf32> to vector<8x128xf32>
    %6 = arith.addf %3, %5 : vector<8x128xf32>
    %c0_5 = arith.constant 0 : index
    %c0_6 = arith.constant 0 : index
    %7 = vector.load %arg5[%c0_5, %c0_6] : memref<8x128xf32, #tpu.memory_space<vmem>>, vector<8x128xf32>
    tpu.vector_store %arg5[%c0_5, %c0_6], %6 {strides = array<i32>} : memref<8x128xf32, #tpu.memory_space<vmem>>, vector<8x128xf32>,
    return
  }
  func.func @transform_0(%arg0: i32, %arg1: i32) -> (i32, i32) {
    %c0_i32 = arith.constant 0 : i32
    %c0_i32_0 = arith.constant 0 : i32
    return %arg0, %c0_i32 : i32, i32
  }
  func.func @transform_1(%arg0: i32, %arg1: i32) -> (i32, i32) {
    %c0_i32 = arith.constant 0 : i32
    %c0_i32_0 = arith.constant 0 : i32
    return %c0_i32, %arg1 : i32, i32
  }
  func.func @transform_2(%arg0: i32, %arg1: i32) -> (i32, i32) {
    %c0_i32 = arith.constant 0 : i32
    %c0_i32_0 = arith.constant 0 : i32
    return %c0_i32, %arg1 : i32, i32
  }
  func.func @transform_3(%arg0: i32, %arg1: i32) -> (i32, i32) {
    %c0_i32 = arith.constant 0 : i32
    return %arg0, %arg1 : i32, i32
  }
}

</mosaic_0001>

<bundles_post_ra>
// kernel: tpu_custom_call.1
= control target key start
LH: loop header
LB: loop body
LE: loop exit
PB: predicated region body
PF: predicated region fallthrough
CT: control target
= control target key end

     0   :  { %8 = vsyncpa [#allocation3], 0  ;;  %s1008_s0 = inlined_call_operand.hbm [shape: f32[8,128], index: 0, kind: input, shape index: {}]   ;;  %s1009_s1 = inlined_call_operand.hbm [shape: bf16[128,256], index: 1, kind: input, shape index: {}]   ;;  %s1010_s2 = inlined_call_operand.vmem [shape: f32[1,256], index: 2, kind: input, shape index: {}]   ;;  %s1011_s3 = inlined_call_operand.hbm [shape: f32[8,256], index: 3, kind: output, shape index: {}]  }
   0x1   :  { %9 = vsyncpa [#allocation6], 0 }
   0x2   :  { %11 = vsyncpa [#allocation6 + $0x1], 0 }
   0x3   :  { %12 = vsyncpa [#allocation4], 0 }
   0x4   :  { %14 = vsyncpa [#allocation4 + $0x1], 0  ;;  %s783_s12 = smov 0   ;;  %s785_s13 = smov 0  }
   0x5   :  { %s787_s14 = smov 0   ;;  %s789_s15 = smov 0  }
   0x6   :  { %s791_s16 = smov 0   ;;  %s793_s17 = smov 0  }
   0x7 LB: > { %s470_s18 = sadd.s32 4294967295, %s753_s17   ;;  %s471_s19 = sadd.s32 4294967294, %s753_s17   ;;  %s753_s17 = sphi %s793_s17, %s20_s17   ;;  %s749_s16 = sphi %s791_s16, %s1039_s16   ;;  %s745_s15 = sphi %s789_s15, %s1038_s15   ;;  %s741_s14 = sphi %s787_s14, %s1037_s14   ;;  %s737_s13 = sphi %s785_s13, %s1036_s13   ;;  %s733_s12 = sphi %s783_s12, %s1035_s12  }
   0x8   : > { %s65_s20 = sadd.s32 1, %s741_s14  ;;  %p72_p0 = scmp.ne.s32.totalorder %s741_s14, %s737_s13 }
   0x9   : > { %p73_p1 = scmp.eq.s32.totalorder %s753_s17, 0  ;;  %p78_p2 = scmp.ne.s32.totalorder %s737_s13, %s733_s12 }
   0xa   : > { %p821_p3 = scmp.eq.s32.totalorder %s470_s18, 0  ;;  %p130_p4 = scmp.eq.s32.totalorder %s470_s18, 1 }
   0xb   : > { %p825_p5 = por %p73_p1, %p72_p0  ;;  %p136_p6 = scmp.eq.s32.totalorder %s471_s19, 1 }
   0xc   : > { %s1018_s21 = scalar_select %p821_p3, 1, 0 }
   0xd   : > { %p831_p7 = por %p821_p3, %p78_p2  ;;  %p835_p8 = por %p130_p4, %p72_p0 }
   0xe   : > { %p839_p9 = por %p136_p6, %p78_p2  ;;  %p472_p10 = scmp.ge.s32.totalorder %s753_s17, 1 }
   0xf   : > { %s1020_s23 = scalar_select %p831_p7, 1, 0 }
  0x10   : > { %s1021_s24 = scalar_select %p835_p8, 1, 0 }
  0x11   : > { %s1022_s25 = scalar_select %p839_p9, 1, 0 }
  0x12   : > { %p143_p11 = scmp.lt.s32.totalorder %s753_s17, 3  ;;  %s755_s27 = smov [#allocation2]  }
  0x13   : > { %s158_s28 = sshll.u32 %s755_s27, 4  ;;  %p544_p1 = scmp.lt.s32.totalorder %s753_s17, 2  ;;  %s159_s28 = int_to_ptr.vmem [resolvable:$true] %s158_s28 }
  0x14   : > { %p846_p13 = pnand %p472_p10, %p143_p11  ;;  %s29_s4 = sadd.s32 1, %s749_s16 }
  0x15   : > { %p855_p4 = pnand %p544_p1, %p825_p5  ;;  %p866_p6 = scmp.ge.s32.totalorder %s29_s4, 2 }
  0x16   : > { %s1023_s26 = scalar_select %p846_p13, 1, 0 }
  0x17   : > { %p531_p0 = pneg %p846_p13  ;;  %s169_s6 = sand.u32 1, %s741_s14  }
  0x18   : > { %s1024_s29 = scalar_select %p855_p4, 1, 0 }
  0x19   : > { %p861_p2 = pnand %p531_p0, %p821_p3  ;;  %s609_s9 = scalar_lea.hbm %s1008_s0, 128 }
  0x1a   : > { %s1026_s5 = scalar_select %p866_p6, 1, 0 }
  0x1b   : > { %p610_p5 = scmp.ne.s32.totalorder %s1008_s0, %s609_s9  ;;  %p611_p10 = pneg %p861_p2 }
  0x1c   : > { %p616_p0 = scmp.lt.u32.totalorder %s609_s9, %s1008_s0 }
  0x1d   : > { %p612_p11 = pnand %p611_p10, %p610_p5 }
  0x1f   : > { %p613_p1 = pneg %p612_p11 }
  0x21   : > { %p618_p12 = pnand %p616_p0, %p613_p1 }
  0x23   : > { %621 = shalt.err (!%p618_p12)
}
  0x24   : > { %s622_s22 = scalar_lea.vmem %s159_s28, 128  ;;  %p630_p3 = scmp.lt.s32.totalorder %s159_s28, %s159_s28 }
  0x25   : > { %p623_p9 = scmp.ne.s32.totalorder %s159_s28, %s622_s22  ;;  %p631_p13 = scmp.lt.s32.totalorder %s622_s22, %s622_s22 }
  0x27   : > { %p625_p8 = pnand %p623_p9, %p611_p10  ;;  %p632_p4 = por %p631_p13, %p630_p3 }
  0x29   : > { %p626_p7 = pneg %p625_p8 }
  0x2b   : > { %p633_p6 = pnand %p632_p4, %p626_p7 }
  0x2d   : > { %636 = shalt.err (!%p633_p6)
}
  0x2e   : > { %534 = dma.hbm_to_vmem [thread:$0]  (!%p861_p2), %s1008_s0, 128, %s159_s28, [#allocation3]  }
  0x2f   : > { %p1027_p9 = scmp.ne.s32.totalorder %s1026_s5, 0  ;;  %s475_s8 = sshll.u32 %s169_s6, 6 }
  0x30   : > { %s476_s10 = sshll.u32 %s749_s16, 6  ;;  %s173_s19 = scalar_lea.vmem [#allocation5], %s475_s8 }
  0x31   : > { %s1041_s4 = smov (%p1027_p9, %s29_s4), 0  ;;  %s897_s18 = scalar_lea.hbm %s1009_s1, %s476_s10 }
  0x32   : > { %s62_s9 = ssub.s32 %s749_s16, %s1041_s4  ;;  %s179_s22 = sshll.u32 %s173_s19, 4  ;;  %s904_s22 = int_to_ptr.vmem [resolvable:$true] %s179_s22 }
  0x33   : > { %p63_p3 = scmp.eq.s32.totalorder %s62_s9, 0  ;;  %s906_s5 = scalar_lea.sflag [#allocation6], %s169_s6 }
  0x34   : > { %s637_s27 = scalar_lea.hbm %s897_s18, 1024  ;;  %p1028_p8 = scmp.ne.s32.totalorder %s1024_s29, 0 }
  0x35   : > { %s902_s28 = scalar_select %p63_p3, %s741_s14, %s65_s20  }
  0x36   : > { %p638_p7 = scmp.ne.s32.totalorder %s897_s18, %s637_s27  ;;  %p639_p12 = pneg %p1028_p8 }
  0x37   : > { %s642_s8 = scalar_lea.hbm %s1009_s1, 2048  ;;  %p643_p2 = scmp.lt.u32.totalorder %s897_s18, %s1009_s1 }
  0x38   : > { %p640_p13 = pnand %p639_p12, %p638_p7  ;;  %p644_p6 = scmp.lt.u32.totalorder %s642_s8, %s637_s27 }
  0x39   : > { %p646_p10 = scmp.lt.u32.totalorder %s637_s27, %s897_s18 }
  0x3a   : > { %p641_p4 = pneg %p640_p13  ;;  %p645_p5 = por %p644_p6, %p643_p2 }
  0x3c   : > { %p647_p11 = por %p646_p10, %p645_p5 }
  0x3e   : > { %p648_p1 = pnand %p647_p11, %p641_p4 }
  0x40   : > { %651 = shalt.err (!%p648_p1)
}
  0x41   : > { %s652_s20 = scalar_lea.vmem %s904_s22, 1024  ;;  %s756_s6 = smov [#allocation5]  }
  0x42   : > { %p653_p0 = scmp.ne.s32.totalorder %s904_s22, %s652_s20  ;;  %s657_s11 = sshll.u32 %s756_s6, 4  ;;  %s658_s11 = int_to_ptr.vmem [resolvable:$false] %s657_s11 }
  0x43   : > { %s659_s19 = scalar_lea.vmem %s658_s11, 2048  ;;  %p660_p7 = scmp.lt.s32.totalorder %s904_s22, %s658_s11 }
  0x44   : > { %p655_p9 = pnand %p653_p0, %p639_p12  ;;  %p661_p13 = scmp.lt.s32.totalorder %s659_s19, %s652_s20 }
  0x46   : > { %p656_p3 = pneg %p655_p9  ;;  %p662_p2 = por %p661_p13, %p660_p7 }
  0x48   : > { %p663_p6 = pnand %p662_p2, %p656_p3 }
  0x4a   : > { %666 = shalt.err (!%p663_p6)
}
  0x4b   : > { %s757_s27 = smov 128   ;;  %s758_s7 = smov 64  }
  0x4c   : > { %s759_s9 = smov 4   ;;  %p1029_p12 = scmp.ne.s32.totalorder %s1023_s26, 0 }
  0x4d   : > { %538 = dma.hbm_to_vmem [thread:$0]  (!%p1028_p8), %s897_s18, 1024, %s904_s22, %s906_s5, %s757_s27, %s758_s7, %s759_s9  }
  0x4e   : > { %197 = sbr.rel (%p1029_p12) target bundleno = 351 (0x15f), region = 32  ;;  %p1030_p4 = scmp.ne.s32.totalorder (!%p1029_p12), %s1018_s21, 0 }
  0x55   : > { %720 = dma.done.wait (%p1030_p4), [#allocation3], 128  }
  0x56   : > { %722 = vsyncadd (%p1030_p4), [#allocation3], 4294967168  ;;  %s941_s8 = sand.u32 1, %s737_s13   ;;  %p1031_p5 = scmp.ne.s32.totalorder %s1020_s23, 0 }
  0x57   : > { %s479_s10 = sshll.u32 %s941_s8, 6  ;;  %s204_s30 = scalar_lea.sflag [#allocation6], %s941_s8 }
  0x58   : > { %s207_s20 = scalar_lea.vmem [#allocation5], %s479_s10 }
  0x59   : > { %724 = dma.done.wait (%p1031_p5), %s204_s30, 1024  }
  0x5a   : > { %726 = vsyncadd (%p1031_p5), %s204_s30, 4294966272  ;;  %v760_v0 = vmov 0.0   ;;  %vm761_vm0 = vmmov 0   ;;  %v601_v1 = vld [vmem:[%s207_s20] sm:$0xff]   ;;  %v602_v2 = vld [vmem:[%s207_s20 + $0x8] sm:$0xff]   ;;  %p233_p8 = scmp.lt.s32.totalorder %s745_s15, 1 }
  0x5b   : > { %503 = vmatprep.subr.bf16.mxu0 %v760_v0  ;;  %519 = vmatprep.mubr.msk.bf16.mxu0 %vm761_vm0, %v760_v0  ;;  %v603_v3 = vld [vmem:[%s207_s20 + $0x10] sm:$0xff]   ;;  %v604_v4 = vld [vmem:[%s207_s20 + $0x18] sm:$0xff]   ;;  %v605_v5 = vld [vmem:[%s207_s20 + $0x20] sm:$0xff]   ;;  %s480_s23 = sshll.u32 %s941_s8, 3  ;;  %s491_s22 = sshll.u32 %s745_s15, 7 }
  0x5c   : > { %504 = vmatpush3.bf16.msra.mxu0 %v601_v1  ;;  %v606_v6 = vld [vmem:[%s207_s20 + $0x28] sm:$0xff]   ;;  %v607_v7 = vld [vmem:[%s207_s20 + $0x30] sm:$0xff]   ;;  %v608_v8 = vld [vmem:[%s207_s20 + $0x38] sm:$0xff]   ;;  %s234_s21 = scalar_select %p233_p8, %s745_s15, 1 }
  0x5d   : > { %505 = vmatprep.subr.bf16.mxu0 %v760_v0  ;;  %v237_v9 = vld [vmem:[#allocation2] sm:$0xff]  ;;  %s232_s5 = scalar_lea.vmem [#allocation7], %s480_s23  ;;  %s959_s27 = scalar_lea.hbm %s1011_s3, %s491_s22 }
  0x5e   : > { %v238_v10 = vpack.c.bf16 %v237_v9, %v237_v9  ;;  %s235_s18 = scalar_lea.vmem %s1010_s2, %s234_s21  ;;  %s367_s6 = sshll.u32 %s232_s5, 4  ;;  %s961_s6 = int_to_ptr.vmem [resolvable:$true] %s367_s6 }
  0x5f   : > { %v481_v11 = vld [vmem:[%s235_s18] ss:$0 sm:$0xff]  ;;  %s352_s7 = scalar_lea.sflag [#allocation4], %s941_s8  ;;  %s667_s15 = scalar_lea.vmem %s961_s6, 128 }
  0x60   : > { %506 = vmatpush3.bf16.msra.mxu0 %v602_v2  ;;  %p668_p10 = scmp.ne.s32.totalorder %s961_s6, %s667_s15  ;;  %p1032_p11 = scmp.ne.s32.totalorder %s1021_s24, 0 }
  0x61   : > { %507 = vmatprep.subr.bf16.mxu0 %v760_v0  ;;  %s762_s9 = smov [#allocation7]  }
  0x62   : > { %p669_p1 = pnand %p668_p10, %p1032_p11  ;;  %s671_s10 = sshll.u32 %s762_s9, 4  ;;  %s672_s10 = int_to_ptr.vmem [resolvable:$false] %s671_s10 }
  0x63   : > { %s673_s30 = scalar_lea.vmem %s672_s10, 256  ;;  %p674_p9 = scmp.lt.s32.totalorder %s961_s6, %s672_s10 }
  0x64   : > { %508 = vmatpush3.bf16.msra.mxu0 %v603_v3  ;;  %p670_p0 = pneg %p669_p1  ;;  %p675_p3 = scmp.lt.s32.totalorder %s673_s30, %s667_s15 }
  0x65   : > { %509 = vmatprep.subr.bf16.mxu0 %v760_v0 }
  0x66   : > { %p676_p7 = por %p675_p3, %p674_p9 }
  0x68   : > { %510 = vmatpush3.bf16.msra.mxu0 %v604_v4  ;;  %p677_p13 = pnand %p676_p7, %p670_p0 }
  0x69   : > { %511 = vmatprep.subr.bf16.mxu0 %v760_v0 }
  0x6c   : > { %512 = vmatpush3.bf16.msra.mxu0 %v605_v5 }
  0x6d   : > { %513 = vmatprep.subr.bf16.mxu0 %v760_v0 }
  0x70   : > { %514 = vmatpush3.bf16.msra.mxu0 %v606_v6 }
  0x71   : > { %515 = vmatprep.subr.bf16.mxu0 %v760_v0 }
  0x74   : > { %516 = vmatpush3.bf16.msra.mxu0 %v607_v7 }
  0x75   : > { %517 = vmatprep.subr.bf16.mxu0 %v760_v0 }
  0x78   : > { %518 = vmatpush3.bf16.msra.mxu0 %v608_v8 }
  0x7b   : > { %520 = vmatmul.mubr.bf16.vlgmr.msra.gmra.mrb[0].mxu0 %v238_v10 }
 0x14e   : > { %v344_v12 = vpop.f32.mrb[0].mxu0 }
 0x14f   : > { %v345_v13 = vadd.f32 %v481_v11, %v344_v12  ;;  %v521_v14 = vpop.f32.mrb[1].mxu0 }
 0x150   : > { %v347_v15 = vpop.f32.mrb[2].mxu0 }
 0x151   : > { %350 = vst [vmem:[%s232_s5] sm:$0xff] %v345_v13  ;;  %v522_v16 = vpop.f32.mrb[3].mxu0 }
 0x152   : > { %680 = shalt.err (!%p677_p13)
}
 0x153   : > { %s681_s8 = scalar_lea.hbm %s959_s27, 128  ;;  %s685_s23 = scalar_lea.hbm %s1011_s3, 256 }
 0x154   : > { %p682_p2 = scmp.ne.s32.totalorder %s959_s27, %s681_s8  ;;  %p686_p4 = scmp.lt.u32.totalorder %s959_s27, %s1011_s3 }
 0x155   : > { %p687_p5 = scmp.lt.u32.totalorder %s685_s23, %s681_s8  ;;  %p689_p10 = scmp.lt.u32.totalorder %s681_s8, %s959_s27 }
 0x156   : > { %p683_p6 = pnand %p682_p2, %p1032_p11 }
 0x157   : > { %p688_p8 = por %p687_p5, %p686_p4 }
 0x158   : > { %p684_p12 = pneg %p683_p6 }
 0x159   : > { %p690_p1 = por %p689_p10, %p688_p8 }
 0x15b   : > { %p691_p0 = pnand %p690_p1, %p684_p12 }
 0x15d   : > { %694 = shalt.err (!%p691_p0)
}
 0x15e   : > { %529 = dma.vmem_to_hbm [thread:$0]  (%p1032_p11), %s961_s6, 128, %s959_s27, %s352_s7  }
 0x15f PF: > { %s379_s18 = sand.u32 1, %s733_s12   ;;  %p1033_p9 = scmp.ne.s32.totalorder %s1022_s25, 0 }
 0x160   : > { %p1034_p3 = scmp.ge.s32.totalorder %s753_s17, 2  ;;  %s380_s22 = scalar_lea.sflag [#allocation4], %s379_s18 }
 0x162   : > { %p540_p7 = pnand %p1034_p3, %p1033_p9 }
 0x164   : > { %728 = dma.done.wait (!%p540_p7), %s380_s22, 128  }
 0x165   : > { %730 = vsyncadd (!%p540_p7), %s380_s22, 4294967168  ;;  %s20_s17 = sadd.s32 1, %s753_s17   ;;  %s1035_s12 = smov %s737_s13 }
 0x166   : > { %p17_p13 = scmp.ge.s32.totalorder %s20_s17, 4   ;;  %s1036_s13 = smov %s741_s14 }
 0x167   : > { %s1037_s14 = smov %s902_s28  ;;  %s1038_s15 = smov %s749_s16 }
 0x168   : > { %s1039_s16 = smov %s1041_s4  ;;  %19 = sbr.rel (!%p17_p13) target bundleno = 7 (0x7), region = 86 }
 0x16f   :  { %385 = vsyncpa [#allocation3], 1 }
 0x170   :  { %387 = vsyncpa [#allocation3 + $0x1], 1 }
 0x171   :  { %388 = vsyncpa [#allocation6], 1 }
 0x172   :  { %390 = vsyncpa [#allocation6 + $0x1], 1 }
 0x173   :  { %391 = vsyncpa [#allocation4], 1 }
 0x174   :  { %393 = vsyncpa [#allocation4 + $0x1], 1 }

</bundles_post_ra>
